<compile_context>
chip_gen: v5e
topology: v5e:2x2
jax: 0.10.0
libtpu: 0.0.40
codegen_flags: <defaults>
</compile_context>

<pallas_src>
import jax
import jax.numpy as jnp
from jax.experimental import pallas as pl
from jax.experimental.pallas import tpu as pltpu


def satvn_kernel(x_ref, w1x_ref, beff_ref, weff_ref, wgbd_ref, bgc_ref,
                 out_ref, h_ref):
    """One N-tile of the SATVN decode.

    The recurrence was algebraically reduced (in the wrapper) to
        h_i = relu(xw_i + h_{i-1} @ W_eff[i]),
    with the x-dependent term hoisted into one lane-dense matmul and all
    generator outputs produced by a single block-diagonal matmul at the end.
    """
    T, HP, _ = weff_ref.shape

    # Step-independent term (one MXU call):
    #   xw[:, i*HP:(i+1)*HP] == x @ W1_x[i] + b_eff[i]
    xw = (
        jnp.dot(x_ref[...], w1x_ref[...], preferred_element_type=jnp.float32)
        + beff_ref[...]
    )  # [tile_n, T*HP]

    # TODO(synk): Truncated_Cauchy_self_attention_block (hidden_layer2) is not
    # defined in the reference source; it is treated as identity on the hidden
    # activations.

    # Serial recurrence: exactly one dependent MXU op per step (T is small,
    # static unroll).  HP-wide blocks are lane-tile aligned, so the slices and
    # scratch stores are unmasked / free.
    h = jnp.maximum(xw[:, 0:HP], 0.0)             # step 0 has no recurrence
    h_ref[:, 0:HP] = h
    for i in range(1, T):
        pre = xw[:, i * HP:(i + 1) * HP] + jnp.dot(
            h, weff_ref[i], preferred_element_type=jnp.float32)
        h = jnp.maximum(pre, 0.0)
        h_ref[:, i * HP:(i + 1) * HP] = h

    # All T generator outputs at once: [tile_n, T*HP] @ blockdiag [T*HP, T*O],
    # then a single contiguous store.
    out_ref[...] = (
        jnp.dot(h_ref[...], wgbd_ref[...], preferred_element_type=jnp.float32)
        + bgc_ref[...]
    ).astype(out_ref.dtype)


def _pick_tile_n(n):
    if n <= 256:
        return n
    for t in (256, 128, 64, 32, 16, 8):
        if n % t == 0:
            return t
    return n


def satvn_forward(x, w1, b1, wg, bg):
    """x: [N, input_dim*in_seq_length]; returns [out_seq_length, N, output_dim]."""
    T, d_full, H = w1.shape
    N, Din = x.shape
    O = wg.shape[2]
    assert d_full == Din + H + O
    HP = ((H + 127) // 128) * 128        # pad hidden blocks to the 128-lane tile

    x = x.astype(jnp.float32)

    # ---- One-time parameter repack (plain JAX, outside the kernel) ---------
    w1x = jnp.transpose(w1[:, :Din, :], (1, 0, 2))           # [Din, T, H]
    w1h = w1[:, Din:Din + H, :]                               # [T, H, H]
    w1o = w1[:, Din + H:, :]                                  # [T, O, H]

    # Fold the o-recurrence into an effective h-weight / bias:
    #   W_eff[i] = w1h[i] + wg[i-1] @ w1o[i]     (i >= 1)
    #   b_eff[i] = b1[i]  + bg[i-1] @ w1o[i]     (i >= 1)
    weff = w1h
    beff = b1[:, 0, :]                                        # [T, H]
    if T > 1:
        weff = weff.at[1:].add(jnp.einsum('tio,toj->tij', wg[:-1], w1o[1:]))
        beff = beff.at[1:].add(jnp.einsum('to,toh->th', bg[:-1, 0, :], w1o[1:]))
    weff = weff.at[0].set(0.0)          # step 0: Linear(Din, H) only, no recurrence

    # Lane-pad every per-step hidden block to HP so in-kernel slices align.
    w1x_p = jnp.zeros((Din, T, HP), jnp.float32).at[:, :, :H].set(w1x)
    w1x_p = w1x_p.reshape(Din, T * HP)
    beff_p = jnp.zeros((1, T, HP), jnp.float32).at[0, :, :H].set(beff)
    beff_p = beff_p.reshape(1, T * HP)
    weff_p = jnp.zeros((T, HP, HP), jnp.float32).at[:, :H, :H].set(weff)

    # Block-diagonal generator weight: one matmul produces every step's output.
    wgbd = jnp.zeros((T * HP, T * O), jnp.float32)
    for i in range(T):
        wgbd = wgbd.at[i * HP:i * HP + H, i * O:(i + 1) * O].set(wg[i])
    bgc = bg[:, 0, :].reshape(1, T * O)

    tile_n = _pick_tile_n(N)
    grid = (N // tile_n,)

    flops = 2 * N * (Din * T * HP + (T - 1) * HP * HP + T * HP * T * O)
    bytes_accessed = 4 * (x.size + w1x_p.size + beff_p.size + weff_p.size
                          + wgbd.size + bgc.size + N * T * O)

    # Resident weights + double-buffered x/out tiles + xw value + h scratch.
    resident = 4 * (w1x_p.size + beff_p.size + weff_p.size + wgbd.size + bgc.size)
    per_tile = 4 * tile_n * (2 * Din + 2 * T * O + 2 * T * HP)
    vmem_limit = int(min(64 << 20, max(32 << 20, 2 * (resident + per_tile))))

    const2 = lambda n: (0, 0)
    const3 = lambda n: (0, 0, 0)

    out_flat = pl.pallas_call(
        satvn_kernel,
        out_shape=jax.ShapeDtypeStruct((N, T * O), jnp.float32),
        grid=grid,
        in_specs=[
            pl.BlockSpec((tile_n, Din), lambda n: (n, 0)),   # x tile (per grid step)
            pl.BlockSpec((Din, T * HP), const2),             # weights: resident
            pl.BlockSpec((1, T * HP), const2),
            pl.BlockSpec((T, HP, HP), const3),
            pl.BlockSpec((T * HP, T * O), const2),
            pl.BlockSpec((1, T * O), const2),
        ],
        out_specs=pl.BlockSpec((tile_n, T * O), lambda n: (n, 0)),
        scratch_shapes=[pltpu.VMEM((tile_n, T * HP), jnp.float32)],
        compiler_params=pltpu.CompilerParams(
            dimension_semantics=("parallel",),
            vmem_limit_bytes=vmem_limit,
        ),
        cost_estimate=pl.CostEstimate(
            flops=flops, transcendentals=0, bytes_accessed=bytes_accessed),
    )(x, w1x_p, beff_p, weff_p, wgbd, bgc)

    # [N, T*O] -> [T, N, O]
    # (matches PyTorch outputs[out_seq_length, n_samples, output_dim])
    return jnp.transpose(out_flat.reshape(N, T, O), (1, 0, 2))


def satvn_reference(x, w1, b1, wg, bg):
    """Pure-JAX reference of the original (unfolded) forward pass."""
    N = x.shape[0]
    T, _, H = w1.shape
    O = wg.shape[2]
    outs = []
    ncell = jnp.concatenate(
        [x, jnp.zeros((N, H), jnp.float32), jnp.zeros((N, O), jnp.float32)], axis=1
    )
    for i in range(T):
        h = jax.nn.relu(ncell @ w1[i] + b1[i, 0])
        o = h @ wg[i] + bg[i, 0]
        outs.append(o)
        ncell = jnp.concatenate([x, h, o], axis=1)
    return jnp.stack(outs)


def init_params(key, input_dim, in_seq_length, hidden_dim, output_dim, out_seq_length):
    """Deterministic synthetic parameters mirroring the nn.Linear shapes."""
    Din = input_dim * in_seq_length
    d_full = Din + hidden_dim + output_dim
    k = jax.random.split(key, 4 * out_seq_length)

    w1_list, b1_list = [], []
    for i in range(out_seq_length):
        in_f = Din if i == 0 else d_full
        w = 0.1 * jax.random.normal(k[4 * i + 0], (in_f, hidden_dim), jnp.float32)
        if i == 0:
            # zero-pad step-0 weight to the full cell-input width; the kernel
            # never uses these rows (W_eff[0] is zeroed) so this is exact.
            w = jnp.concatenate(
                [w, jnp.zeros((d_full - Din, hidden_dim), jnp.float32)], axis=0
            )
        b = 0.1 * jax.random.normal(k[4 * i + 1], (hidden_dim,), jnp.float32)
        w1_list.append(w)
        b1_list.append(b[None, :])

    wg_list, bg_list = [], []
    for i in range(out_seq_length):
        wg_list.append(
            0.1 * jax.random.normal(k[4 * i + 2], (hidden_dim, output_dim), jnp.float32)
        )
        bg_list.append(
            0.1 * jax.random.normal(k[4 * i + 3], (output_dim,), jnp.float32)[None, :]
        )

    w1 = jnp.stack(w1_list)   # [T, d_full, H]
    b1 = jnp.stack(b1_list)   # [T, 1, H]
    wg = jnp.stack(wg_list)   # [T, H, O]
    bg = jnp.stack(bg_list)   # [T, 1, O]
    return w1, b1, wg, bg


if __name__ == "__main__":
    # Small, forward-consistent shapes
    input_dim = 4
    in_seq_length = 4       # -> input_dim_comb = 16
    hidden_dim = 32
    output_dim = 4
    out_seq_length = 3
    n_samples = 8

    key = jax.random.PRNGKey(0)
    k_x, k_p = jax.random.split(key)

    # input: [n_samples, input_dim * in_seq_length]
    x = jax.random.normal(k_x, (n_samples, input_dim * in_seq_length), jnp.float32)
    # target is only consumed when is_training=True; unused in this inference path.

    w1, b1, wg, bg = init_params(
        k_p, input_dim, in_seq_length, hidden_dim, output_dim, out_seq_length
    )

    out = satvn_forward(x, w1, b1, wg, bg)
    out = jax.block_until_ready(out)

    ref = satvn_reference(x, w1, b1, wg, bg)
    assert out.shape == (out_seq_length, n_samples, output_dim)
    # The algebraic fold (o-recurrence merged into W_eff) is mathematically
    # identical but changes floating-point rounding order, and TPU matmul
    # precision defaults differ between the XLA reference and the MXU path,
    # so the tolerance is loosened from 1e-5.  Real structural bugs produce
    # errors orders of magnitude above this.
    assert jnp.allclose(out, ref, atol=2e-3, rtol=2e-3), "mismatch vs JAX reference"

    print("KERNEL_OK")
</pallas_src>

<mosaic_0001>
module attributes {stable_mosaic.version = 11 : i64} {
  func.func @satvn_kernel(%arg0: i32, %arg1: memref<8x16xf32, #tpu.memory_space<vmem>>, %arg2: memref<16x384xf32, #tpu.memory_space<vmem>>, %arg3: memref<1x384xf32, #tpu.memory_space<vmem>>, %arg4: memref<3x128x128xf32, #tpu.memory_space<vmem>>, %arg5: memref<384x12xf32, #tpu.memory_space<vmem>>, %arg6: memref<1x12xf32, #tpu.memory_space<vmem>>, %arg7: memref<8x12xf32, #tpu.memory_space<vmem>>, %arg8: memref<8x384xf32, #tpu.memory_space<vmem>>) attributes {dimension_semantics = [#tpu.dimension_semantics<parallel>], iteration_bounds = array<i64: 1>, scalar_prefetch = 0 : i64, scratch_operands = 1 : i64, tpu.core_type = #tpu.core_type<tc>, window_params = [{transform_indices = @transform_0, window_bounds = array<i64: 8, 16>}, {pipeline_mode = #tpu.pipeline_mode<synchronous>, transform_indices = @transform_1, window_bounds = array<i64: 16, 384>}, {pipeline_mode = #tpu.pipeline_mode<synchronous>, transform_indices = @transform_2, window_bounds = array<i64: 1, 384>}, {pipeline_mode = #tpu.pipeline_mode<synchronous>, transform_indices = @transform_3, window_bounds = array<i64: 3, 128, 128>}, {pipeline_mode = #tpu.pipeline_mode<synchronous>, transform_indices = @transform_4, window_bounds = array<i64: 384, 12>}, {pipeline_mode = #tpu.pipeline_mode<synchronous>, transform_indices = @transform_5, window_bounds = array<i64: 1, 12>}, {transform_indices = @transform_6, window_bounds = array<i64: 8, 12>}]} {
    %c0 = arith.constant 0 : index
    %c0_0 = arith.constant 0 : index
    %0 = vector.load %arg1[%c0, %c0_0] : memref<8x16xf32, #tpu.memory_space<vmem>>, vector<8x16xf32>
    %c0_1 = arith.constant 0 : index
    %c0_2 = arith.constant 0 : index
    %1 = vector.load %arg2[%c0_1, %c0_2] : memref<16x384xf32, #tpu.memory_space<vmem>>, vector<16x384xf32>
    %cst = arith.constant dense<0.000000e+00> : vector<8x384xf32>
    %2 = tpu.matmul %0, %1, %cst {dimension_numbers = #tpu.dot_dimension_numbers<[1], [0], [0], [1], [0, 0, 1, 1], [], []>} : vector<8x16xf32>, vector<16x384xf32>, vector<8x384xf32> -> vector<8x384xf32>
    %c0_3 = arith.constant 0 : index
    %c0_4 = arith.constant 0 : index
    %3 = vector.load %arg3[%c0_3, %c0_4] : memref<1x384xf32, #tpu.memory_space<vmem>>, vector<1x384xf32>
    %4 = vector.broadcast %3 : vector<1x384xf32> to vector<8x384xf32>
    %5 = arith.addf %2, %4 : vector<8x384xf32>
    %6 = vector.extract_strided_slice %5 {offsets = [0, 0], sizes = [8, 128], strides = [1, 1]} : vector<8x384xf32> to vector<8x128xf32>
    %cst_5 = arith.constant 0.000000e+00 : f32
    %7 = vector.broadcast %cst_5 : f32 to vector<8x128xf32>
    %8 = arith.maximumf %6, %7 : vector<8x128xf32>
    %c0_6 = arith.constant 0 : index
    %c0_7 = arith.constant 0 : index
    %9 = vector.load %arg8[%c0_6, %c0_7] : memref<8x384xf32, #tpu.memory_space<vmem>>, vector<8x128xf32>
    tpu.vector_store %arg8[%c0_6, %c0_7], %8 {strides = array<i32>} : memref<8x384xf32, #tpu.memory_space<vmem>>, vector<8x128xf32>,
    %10 = vector.extract_strided_slice %5 {offsets = [0, 128], sizes = [8, 128], strides = [1, 1]} : vector<8x384xf32> to vector<8x128xf32>
    %c1 = arith.constant 1 : index
    %c0_8 = arith.constant 0 : index
    %c0_9 = arith.constant 0 : index
    %11 = vector.load %arg4[%c1, %c0_8, %c0_9] : memref<3x128x128xf32, #tpu.memory_space<vmem>>, vector<1x128x128xf32>
    %12 = vector.shape_cast %11 : vector<1x128x128xf32> to vector<128x128xf32>
    %cst_10 = arith.constant dense<0.000000e+00> : vector<8x128xf32>
    %13 = tpu.matmul %8, %12, %cst_10 {dimension_numbers = #tpu.dot_dimension_numbers<[1], [0], [0], [1], [0, 0, 1, 1], [], []>} : vector<8x128xf32>, vector<128x128xf32>, vector<8x128xf32> -> vector<8x128xf32>
    %14 = arith.addf %10, %13 : vector<8x128xf32>
    %cst_11 = arith.constant 0.000000e+00 : f32
    %15 = vector.broadcast %cst_11 : f32 to vector<8x128xf32>
    %16 = arith.maximumf %14, %15 : vector<8x128xf32>
    %c0_12 = arith.constant 0 : index
    %c128 = arith.constant 128 : index
    %17 = vector.load %arg8[%c0_12, %c128] : memref<8x384xf32, #tpu.memory_space<vmem>>, vector<8x128xf32>
    tpu.vector_store %arg8[%c0_12, %c128], %16 {strides = array<i32>} : memref<8x384xf32, #tpu.memory_space<vmem>>, vector<8x128xf32>,
    %18 = vector.extract_strided_slice %5 {offsets = [0, 256], sizes = [8, 128], strides = [1, 1]} : vector<8x384xf32> to vector<8x128xf32>
    %c2 = arith.constant 2 : index
    %c0_13 = arith.constant 0 : index
    %c0_14 = arith.constant 0 : index
    %19 = vector.load %arg4[%c2, %c0_13, %c0_14] : memref<3x128x128xf32, #tpu.memory_space<vmem>>, vector<1x128x128xf32>
    %20 = vector.shape_cast %19 : vector<1x128x128xf32> to vector<128x128xf32>
    %cst_15 = arith.constant dense<0.000000e+00> : vector<8x128xf32>
    %21 = tpu.matmul %16, %20, %cst_15 {dimension_numbers = #tpu.dot_dimension_numbers<[1], [0], [0], [1], [0, 0, 1, 1], [], []>} : vector<8x128xf32>, vector<128x128xf32>, vector<8x128xf32> -> vector<8x128xf32>
    %22 = arith.addf %18, %21 : vector<8x128xf32>
    %cst_16 = arith.constant 0.000000e+00 : f32
    %23 = vector.broadcast %cst_16 : f32 to vector<8x128xf32>
    %24 = arith.maximumf %22, %23 : vector<8x128xf32>
    %c0_17 = arith.constant 0 : index
    %c256 = arith.constant 256 : index
    %25 = vector.load %arg8[%c0_17, %c256] : memref<8x384xf32, #tpu.memory_space<vmem>>, vector<8x128xf32>
    tpu.vector_store %arg8[%c0_17, %c256], %24 {strides = array<i32>} : memref<8x384xf32, #tpu.memory_space<vmem>>, vector<8x128xf32>,
    %c0_18 = arith.constant 0 : index
    %c0_19 = arith.constant 0 : index
    %26 = vector.load %arg8[%c0_18, %c0_19] : memref<8x384xf32, #tpu.memory_space<vmem>>, vector<8x384xf32>
    %c0_20 = arith.constant 0 : index
    %c0_21 = arith.constant 0 : index
    %27 = vector.load %arg5[%c0_20, %c0_21] : memref<384x12xf32, #tpu.memory_space<vmem>>, vector<384x12xf32>
    %cst_22 = arith.constant dense<0.000000e+00> : vector<8x12xf32>
    %28 = tpu.matmul %26, %27, %cst_22 {dimension_numbers = #tpu.dot_dimension_numbers<[1], [0], [0], [1], [0, 0, 1, 1], [], []>} : vector<8x384xf32>, vector<384x12xf32>, vector<8x12xf32> -> vector<8x12xf32>
    %c0_23 = arith.constant 0 : index
    %c0_24 = arith.constant 0 : index
    %29 = vector.load %arg6[%c0_23, %c0_24] : memref<1x12xf32, #tpu.memory_space<vmem>>, vector<1x12xf32>
    %30 = vector.broadcast %29 : vector<1x12xf32> to vector<8x12xf32>
    %31 = arith.addf %28, %30 : vector<8x12xf32>
    %c0_25 = arith.constant 0 : index
    %c0_26 = arith.constant 0 : index
    %32 = vector.load %arg7[%c0_25, %c0_26] : memref<8x12xf32, #tpu.memory_space<vmem>>, vector<8x12xf32>
    tpu.vector_store %arg7[%c0_25, %c0_26], %31 {strides = array<i32>} : memref<8x12xf32, #tpu.memory_space<vmem>>, vector<8x12xf32>,
    return
  }
  func.func @transform_0(%arg0: i32) -> (i32, i32) {
    %c0_i32 = arith.constant 0 : i32
    %c0_i32_0 = arith.constant 0 : i32
    return %arg0, %c0_i32 : i32, i32
  }
  func.func @transform_1(%arg0: i32) -> (i32, i32) {
    %c0_i32 = arith.constant 0 : i32
    %c0_i32_0 = arith.constant 0 : i32
    %c0_i32_1 = arith.constant 0 : i32
    return %c0_i32, %c0_i32_0 : i32, i32
  }
  func.func @transform_2(%arg0: i32) -> (i32, i32) {
    %c0_i32 = arith.constant 0 : i32
    %c0_i32_0 = arith.constant 0 : i32
    %c0_i32_1 = arith.constant 0 : i32
    return %c0_i32, %c0_i32_0 : i32, i32
  }
  func.func @transform_3(%arg0: i32) -> (i32, i32, i32) {
    %c0_i32 = arith.constant 0 : i32
    %c0_i32_0 = arith.constant 0 : i32
    %c0_i32_1 = arith.constant 0 : i32
    %c0_i32_2 = arith.constant 0 : i32
    return %c0_i32, %c0_i32_0, %c0_i32_1 : i32, i32, i32
  }
  func.func @transform_4(%arg0: i32) -> (i32, i32) {
    %c0_i32 = arith.constant 0 : i32
    %c0_i32_0 = arith.constant 0 : i32
    %c0_i32_1 = arith.constant 0 : i32
    return %c0_i32, %c0_i32_0 : i32, i32
  }
  func.func @transform_5(%arg0: i32) -> (i32, i32) {
    %c0_i32 = arith.constant 0 : i32
    %c0_i32_0 = arith.constant 0 : i32
    %c0_i32_1 = arith.constant 0 : i32
    return %c0_i32, %c0_i32_0 : i32, i32
  }
  func.func @transform_6(%arg0: i32) -> (i32, i32) {
    %c0_i32 = arith.constant 0 : i32
    %c0_i32_0 = arith.constant 0 : i32
    return %arg0, %c0_i32 : i32, i32
  }
}

</mosaic_0001>

<bundles_post_ra>
// kernel: tpu_custom_call.1
= control target key start
LH: loop header
LB: loop body
LE: loop exit
PB: predicated region body
PF: predicated region fallthrough
CT: control target
= control target key end

     0   :  { %11 = vsyncpa [#allocation4], 0  ;;  %s786_s0 = inlined_call_operand.hbm [shape: f32[8,16], index: 0, kind: input, shape index: {}]   ;;  %s787_s1 = inlined_call_operand.vmem [shape: f32[16,384], index: 1, kind: input, shape index: {}]   ;;  %s788_s2 = inlined_call_operand.hbm [shape: f32[1,384], index: 2, kind: input, shape index: {}]   ;;  %s789_s3 = inlined_call_operand.vmem [shape: f32[3,128,128], index: 3, kind: input, shape index: {}]   ;;  %s790_s4 = inlined_call_operand.vmem [shape: f32[384,12], index: 4, kind: input, shape index: {}]   ;;  %s791_s5 = inlined_call_operand.vmem [shape: f32[1,12], index: 5, kind: input, shape index: {}]   ;;  %s792_s6 = inlined_call_operand.hbm [shape: f32[8,12], index: 6, kind: output, shape index: {}]  }
   0x1   :  { %12 = vsyncpa [#allocation7], 0 }
   0x2   :  { %13 = vsyncpa [#allocation5], 0  ;;  %s19_s23 = sshll.u32 %s786_s0, 4  ;;  %s465_s24 = smov [#allocation3]   ;;  %s20_s23 = int_to_ptr.hbm [resolvable:$true] %s19_s23 }
   0x3   :  { %s21_s25 = sshll.u32 %s465_s24, 4  ;;  %s32_s28 = sshll.u32 %s788_s2, 4  ;;  %s22_s25 = int_to_ptr.vmem [resolvable:$true] %s21_s25  ;;  %s33_s28 = int_to_ptr.hbm [resolvable:$true] %s32_s28 }
   0x4   :  { %24 = dma.hbm_to_vmem [thread:$0]  %s20_s23, 128, %s22_s25, [#allocation4]  }
   0x5   :  { %s466_s29 = smov [#allocation6]  }
   0x6   :  { %s34_s30 = sshll.u32 %s466_s29, 4  ;;  %s35_s30 = int_to_ptr.vmem [resolvable:$true] %s34_s30 }
   0x7   :  { %37 = dma.hbm_to_vmem [thread:$0]  %s33_s28, 48, %s35_s30, [#allocation7]  }
   0x8   :  { %459 = dma.done.wait [#allocation4], 128  }
   0x9   :  { %460 = vsyncadd [#allocation4], 4294967168 }
   0xa   :  { %461 = dma.done.wait [#allocation7], 48  }
   0xb   :  { %462 = vsyncadd [#allocation7], 4294967248  ;;  %v56_v0 = vld [vmem:[%s787_s1 + $0x18] sm:$0xff]  ;;  %v53_v1 = vld [vmem:[%s787_s1] sm:$0xff]  ;;  %vm67_vm0 = vcmask 130048   ;;  %s337_s20 = sshll.u32 %s792_s6, 4  ;;  %s338_s20 = int_to_ptr.hbm [resolvable:$true] %s337_s20 }
   0xc   :  { %v515_v2 = vld [vmem:[#allocation3] sm:$0xff]  ;;  %85 = vmatpush.msra.mxu0 %v56_v0  ;;  %v54_v4 = vld [vmem:[%s787_s1 + $0x8] sm:$0xff]  ;;  %v366_v5 = vld [vmem:[%s789_s3 + $0xf8] sm:$0xff]  ;;  %vm328_vm1 = vcmask 97280  }
   0xd   :  { %v57_v3 = vld [vmem:[%s787_s1 + $0x20] sm:$0xff]  ;;  %150 = vmatpush.msra.mxu3 %v366_v5  ;;  %v231_v6 = vld [vmem:[%s790_s4 + $0x78] sm:$0xff]  ;;  %v365_v7 = vld [vmem:[%s789_s3 + $0xf0] sm:$0xff] }
   0xe   :  { %105 = vmatpush.msra.mxu1 %v57_v3  ;;  %86 = vmatpush.msra.mxu0 %v53_v1  ;;  %v230_v8 = vld [vmem:[%s790_s4 + $0x70] sm:$0xff]  ;;  %v364_v9 = vld [vmem:[%s789_s3 + $0xe8] sm:$0xff]  ;;  %v363_v11 = vld [vmem:[%s789_s3 + $0xe0] sm:$0xff] }
   0xf   :  { %348 = vmatmul.msk.f32.vlgmr.msra.gmra.mxu0 %vm67_vm0, %v515_v2  ;;  %151 = vmatpush.msra.mxu3 %v365_v7  ;;  %v229_v10 = vld [vmem:[%s790_s4 + $0x68] sm:$0xff]  ;;  %v228_v12 = vld [vmem:[%s790_s4 + $0x60] sm:$0xff]  ;;  %v362_v13 = vld [vmem:[%s789_s3 + $0xd8] sm:$0xff] }
  0x10   :  { %106 = vmatpush.msra.mxu1 %v54_v4  ;;  %v227_v14 = vld [vmem:[%s790_s4 + $0x58] sm:$0xff]  ;;  %v361_v15 = vld [vmem:[%s789_s3 + $0xd0] sm:$0xff]  ;;  %v360_v17 = vld [vmem:[%s789_s3 + $0xc8] sm:$0xff] }
  0x11   :  { %349 = vmatmul.msk.f32.vlgmr.msra.gmra.mxu1 %vm67_vm0, %v515_v2  ;;  %152 = vmatpush.msra.mxu3 %v364_v9  ;;  %v226_v16 = vld [vmem:[%s790_s4 + $0x50] sm:$0xff]  ;;  %v225_v18 = vld [vmem:[%s790_s4 + $0x48] sm:$0xff]  ;;  %v359_v19 = vld [vmem:[%s789_s3 + $0xc0] sm:$0xff] }
  0x12   :  { %268 = vmatpush.msrb.mxu1 %v231_v6  ;;  %v224_v20 = vld [vmem:[%s790_s4 + $0x40] sm:$0xff]  ;;  %v358_v21 = vld [vmem:[%s789_s3 + $0xb8] sm:$0xff]  ;;  %v357_v23 = vld [vmem:[%s789_s3 + $0xb0] sm:$0xff] }
  0x13   :  { %153 = vmatpush.msra.mxu3 %v363_v11  ;;  %v223_v22 = vld [vmem:[%s790_s4 + $0x38] sm:$0xff]  ;;  %v222_v24 = vld [vmem:[%s790_s4 + $0x30] sm:$0xff]  ;;  %v356_v25 = vld [vmem:[%s789_s3 + $0xa8] sm:$0xff] }
  0x14   :  { %269 = vmatpush.msrb.mxu1 %v230_v8  ;;  %v221_v26 = vld [vmem:[%s790_s4 + $0x28] sm:$0xff]  ;;  %v355_v27 = vld [vmem:[%s789_s3 + $0xa0] sm:$0xff]  ;;  %v354_v29 = vld [vmem:[%s789_s3 + $0x98] sm:$0xff] }
  0x15   :  { %154 = vmatpush.msra.mxu3 %v362_v13  ;;  %v220_v28 = vld [vmem:[%s790_s4 + $0x20] sm:$0xff]  ;;  %v219_v30 = vld [vmem:[%s790_s4 + $0x18] sm:$0xff]  ;;  %v353_v31 = vld [vmem:[%s789_s3 + $0x90] sm:$0xff] }
  0x16   :  { %270 = vmatpush.msrb.mxu1 %v229_v10  ;;  %v218_v32 = vld [vmem:[%s790_s4 + $0x10] sm:$0xff]  ;;  %v352_v33 = vld [vmem:[%s789_s3 + $0x88] sm:$0xff]  ;;  %v351_v35 = vld [vmem:[%s789_s3 + $0x80] sm:$0xff] }
  0x17   :  { %155 = vmatpush.msra.mxu3 %v361_v15  ;;  %v217_v34 = vld [vmem:[%s790_s4 + $0x8] sm:$0xff]  ;;  %v216_v36 = vld [vmem:[%s790_s4] sm:$0xff]  ;;  %v55_v38 = vld [vmem:[%s787_s1 + $0x10] sm:$0xff] }
  0x18   :  { %271 = vmatpush.msrb.mxu1 %v228_v12  ;;  %v58_v37 = vld [vmem:[%s787_s1 + $0x28] sm:$0xff]  ;;  %v382_v39 = vld [vmem:[%s789_s3 + $0x178] sm:$0xff]  ;;  %v381_v41 = vld [vmem:[%s789_s3 + $0x170] sm:$0xff] }
  0x19   :  { %156 = vmatpush.msra.mxu3 %v360_v17  ;;  %125 = vmatpush.msra.mxu2 %v58_v37  ;;  %v247_v40 = vld [vmem:[%s790_s4 + $0xf8] sm:$0xff]  ;;  %v380_v42 = vld [vmem:[%s789_s3 + $0x168] sm:$0xff]  ;;  %v246_v43 = vld [vmem:[%s790_s4 + $0xf0] sm:$0xff] }
  0x1a   :  { %272 = vmatpush.msrb.mxu1 %v227_v14  ;;  %190 = vmatpush.msrb.mxu0 %v382_v39  ;;  %v379_v44 = vld [vmem:[%s789_s3 + $0x160] sm:$0xff]  ;;  %v245_v45 = vld [vmem:[%s790_s4 + $0xe8] sm:$0xff]  ;;  %v378_v46 = vld [vmem:[%s789_s3 + $0x158] sm:$0xff] }
  0x1b   :  { %157 = vmatpush.msra.mxu3 %v359_v19  ;;  %126 = vmatpush.msra.mxu2 %v55_v38  ;;  %v244_v47 = vld [vmem:[%s790_s4 + $0xe0] sm:$0xff]  ;;  %v377_v48 = vld [vmem:[%s789_s3 + $0x150] sm:$0xff]  ;;  %v243_v49 = vld [vmem:[%s790_s4 + $0xd8] sm:$0xff] }
  0x1c   :  { %273 = vmatpush.msrb.mxu1 %v226_v16  ;;  %191 = vmatpush.msrb.mxu0 %v381_v41  ;;  %v376_v50 = vld [vmem:[%s789_s3 + $0x148] sm:$0xff]  ;;  %v242_v51 = vld [vmem:[%s790_s4 + $0xd0] sm:$0xff]  ;;  %v375_v52 = vld [vmem:[%s789_s3 + $0x140] sm:$0xff] }
  0x1d   :  { %158 = vmatpush.msra.mxu3 %v358_v21  ;;  %288 = vmatpush.msrb.mxu2 %v247_v40  ;;  %v241_v53 = vld [vmem:[%s790_s4 + $0xc8] sm:$0xff]  ;;  %v374_v54 = vld [vmem:[%s789_s3 + $0x138] sm:$0xff]  ;;  %v240_v55 = vld [vmem:[%s790_s4 + $0xc0] sm:$0xff] }
  0x1e   :  { %274 = vmatpush.msrb.mxu1 %v225_v18  ;;  %192 = vmatpush.msrb.mxu0 %v380_v42  ;;  %v373_v56 = vld [vmem:[%s789_s3 + $0x130] sm:$0xff]  ;;  %v239_v57 = vld [vmem:[%s790_s4 + $0xb8] sm:$0xff]  ;;  %v372_v58 = vld [vmem:[%s789_s3 + $0x128] sm:$0xff] }
  0x1f   :  { %159 = vmatpush.msra.mxu3 %v357_v23  ;;  %350 = vmatmul.msk.f32.vlgmr.msra.gmra.mxu2 %vm67_vm0, %v515_v2  ;;  %v238_v59 = vld [vmem:[%s790_s4 + $0xb0] sm:$0xff]  ;;  %v694_v60 = vld [vmem:[#allocation6] sm:$0x7]  ;;  %v371_v2 = vld [vmem:[%s789_s3 + $0x120] sm:$0xff] }
  0x20   :  { %275 = vmatpush.msrb.mxu1 %v224_v20  ;;  %289 = vmatpush.msrb.mxu2 %v246_v43  ;;  %v61_v61 = vperm.slane %v694_v60, 0  ;;  %v237_v1 = vld [vmem:[%s790_s4 + $0xa8] sm:$0xff]  ;;  %v236_v3 = vld [vmem:[%s790_s4 + $0xa0] sm:$0xff]  ;;  %v370_v4 = vld [vmem:[%s789_s3 + $0x118] sm:$0xff]  ;;  %v62_v23 = vperm.slane %v694_v60, 1 }
  0x21   :  { %160 = vmatpush.msra.mxu3 %v356_v25  ;;  %193 = vmatpush.msrb.mxu0 %v379_v44  ;;  %v235_v5 = vld [vmem:[%s790_s4 + $0x98] sm:$0xff]  ;;  %v369_v6 = vld [vmem:[%s789_s3 + $0x110] sm:$0xff]  ;;  %v368_v8 = vld [vmem:[%s789_s3 + $0x108] sm:$0xff] }
  0x22   :  { %276 = vmatpush.msrb.mxu1 %v223_v22  ;;  %290 = vmatpush.msrb.mxu2 %v245_v45  ;;  %v234_v7 = vld [vmem:[%s790_s4 + $0x90] sm:$0xff]  ;;  %v233_v9 = vld [vmem:[%s790_s4 + $0x88] sm:$0xff]  ;;  %v367_v10 = vld [vmem:[%s789_s3 + $0x100] sm:$0xff]  ;;  %s467_s3 = smov [#allocation8]  }
  0x23   :  { %161 = vmatpush.msra.mxu3 %v355_v27  ;;  %194 = vmatpush.msrb.mxu0 %v378_v46  ;;  %v232_v11 = vld [vmem:[%s790_s4 + $0x80] sm:$0xff]  ;;  %v263_v12 = vld [vmem:[%s790_s4 + $0x178] sm:$0xff]  ;;  %v262_v13 = vld [vmem:[%s790_s4 + $0x170] sm:$0xff]  ;;  %s335_s18 = sshll.u32 %s467_s3, 4  ;;  %s336_s18 = int_to_ptr.vmem [resolvable:$true] %s335_s18 }
  0x24   :  { %277 = vmatpush.msrb.mxu1 %v222_v24  ;;  %291 = vmatpush.msrb.mxu2 %v244_v47  ;;  %v261_v14 = vld [vmem:[%s790_s4 + $0x168] sm:$0xff]  ;;  %v260_v15 = vld [vmem:[%s790_s4 + $0x160] sm:$0xff]  ;;  %v259_v16 = vld [vmem:[%s790_s4 + $0x158] sm:$0xff] }
  0x25   :  { %162 = vmatpush.msra.mxu3 %v354_v29  ;;  %195 = vmatpush.msrb.mxu0 %v377_v48  ;;  %v258_v17 = vld [vmem:[%s790_s4 + $0x150] sm:$0xff]  ;;  %v257_v18 = vld [vmem:[%s790_s4 + $0x148] sm:$0xff]  ;;  %v256_v19 = vld [vmem:[%s790_s4 + $0x140] sm:$0xff] }
  0x26   :  { %278 = vmatpush.msrb.mxu1 %v221_v26  ;;  %292 = vmatpush.msrb.mxu2 %v243_v49  ;;  %v255_v20 = vld [vmem:[%s790_s4 + $0x138] sm:$0xff]  ;;  %v254_v21 = vld [vmem:[%s790_s4 + $0x130] sm:$0xff]  ;;  %v253_v22 = vld [vmem:[%s790_s4 + $0x128] sm:$0xff] }
  0x27   :  { %163 = vmatpush.msra.mxu3 %v353_v31  ;;  %196 = vmatpush.msrb.mxu0 %v376_v50  ;;  %v252_v24 = vld [vmem:[%s790_s4 + $0x120] sm:$0xff]  ;;  %v251_v25 = vld [vmem:[%s790_s4 + $0x118] sm:$0xff]  ;;  %v250_v31 = vld [vmem:[%s790_s4 + $0x110] sm:$0xff] }
  0x28   :  { %279 = vmatpush.msrb.mxu1 %v220_v28  ;;  %293 = vmatpush.msrb.mxu2 %v242_v51  ;;  %v386_v40 = vld [vmem:[%s791_s5] ss:$0 sm:$0xff] }
  0x29   :  { %164 = vmatpush.msra.mxu3 %v352_v33  ;;  %197 = vmatpush.msrb.mxu0 %v375_v52  ;;  %v248_v33 = vld [vmem:[%s790_s4 + $0x100] sm:$0xff] }
  0x2a   :  { %280 = vmatpush.msrb.mxu1 %v219_v30  ;;  %294 = vmatpush.msrb.mxu2 %v241_v53 }
  0x2b   :  { %165 = vmatpush.msra.mxu3 %v351_v35  ;;  %198 = vmatpush.msrb.mxu0 %v374_v54 }
  0x2c   :  { %281 = vmatpush.msrb.mxu1 %v218_v32  ;;  %295 = vmatpush.msrb.mxu2 %v240_v55  ;;  %v249_v32 = vld [vmem:[%s790_s4 + $0x108] sm:$0xff] }
  0x2d   :  { %199 = vmatpush.msrb.mxu0 %v373_v56  ;;  %308 = vmatpush.msrb.mxu3 %v263_v12 }
  0x2e   :  { %282 = vmatpush.msrb.mxu1 %v217_v34  ;;  %296 = vmatpush.msrb.mxu2 %v239_v57  ;;  %v63_v34 = vperm.slane %v694_v60, 2 }
  0x2f   :  { %200 = vmatpush.msrb.mxu0 %v372_v58  ;;  %309 = vmatpush.msrb.mxu3 %v262_v13 }
  0x30   :  { %283 = vmatpush.msrb.mxu1 %v216_v36  ;;  %297 = vmatpush.msrb.mxu2 %v238_v59 }
  0x31   :  { %201 = vmatpush.msrb.mxu0 %v371_v2  ;;  %310 = vmatpush.msrb.mxu3 %v261_v14 }
  0x32   :  { %298 = vmatpush.msrb.mxu2 %v237_v1 }
  0x33   :  { %202 = vmatpush.msrb.mxu0 %v370_v4  ;;  %311 = vmatpush.msrb.mxu3 %v260_v15 }
  0x34   :  { %299 = vmatpush.msrb.mxu2 %v236_v3 }
  0x35   :  { %203 = vmatpush.msrb.mxu0 %v369_v6  ;;  %312 = vmatpush.msrb.mxu3 %v259_v16 }
  0x36   :  { %300 = vmatpush.msrb.mxu2 %v235_v5 }
  0x37   :  { %204 = vmatpush.msrb.mxu0 %v368_v8  ;;  %313 = vmatpush.msrb.mxu3 %v258_v17 }
  0x38   :  { %301 = vmatpush.msrb.mxu2 %v234_v7 }
  0x39   :  { %205 = vmatpush.msrb.mxu0 %v367_v10  ;;  %314 = vmatpush.msrb.mxu3 %v257_v18 }
  0x3a   :  { %302 = vmatpush.msrb.mxu2 %v233_v9 }
  0x3b   :  { %315 = vmatpush.msrb.mxu3 %v256_v19 }
  0x3c   :  { %303 = vmatpush.msrb.mxu2 %v232_v11 }
  0x3d   :  { %316 = vmatpush.msrb.mxu3 %v255_v20 }
  0x3f   :  { %317 = vmatpush.msrb.mxu3 %v254_v21 }
  0x41   :  { %318 = vmatpush.msrb.mxu3 %v253_v22 }
  0x43   :  { %319 = vmatpush.msrb.mxu3 %v252_v24 }
  0x45   :  { %320 = vmatpush.msrb.mxu3 %v251_v25 }
  0x47   :  { %321 = vmatpush.msrb.mxu3 %v250_v31 }
  0x49   :  { %322 = vmatpush.msrb.mxu3 %v249_v32 }
  0x4b   :  { %323 = vmatpush.msrb.mxu3 %v248_v33 }
  0x8c   :  { %v88_v62 = vpop.f32.mrf.mxu0 }
  0x8d   :  { %v89_v63 = vadd.f32 %v88_v62, %v61_v61 }
  0x8e   :  { %v108_v26 = vpop.f32.mrf.mxu1 }
  0x8f   :  { %v131_v0 = vmax.f32 %v89_v63, 0.0  ;;  %v109_v27 = vadd.f32 %v108_v26, %v62_v23 }
  0x91   :  { %166 = vmatmul.f32.vlgmr.msra.gmra.mxu3 %v131_v0  ;;  %284 = vmatmul.f32.vlgmr.msrb.gmra.mxu1 %v131_v0 }
  0xa2   :  { %v128_v35 = vpop.f32.mrf.mxu2 }
  0xa3   :  { %v129_v36 = vadd.f32 %v128_v35, %v63_v34 }
 0x10e   :  { %v285_v41 = vpop.f32.mrf.mxu1 }
 0x10f   :  { %v286_v43 = vadd.f32 %v386_v40, %v285_v41 }
 0x114   :  { %v167_v28 = vpop.f32.mrf.mxu3 }
 0x115   :  { %v170_v29 = vadd.f32 %v167_v28, %v109_v27 }
 0x117   :  { %v171_v30 = vmax.f32 %v170_v29, 0.0 }
 0x119   :  { %206 = vmatmul.f32.vlgmr.msrb.gmra.mxu0 %v171_v30  ;;  %304 = vmatmul.f32.vlgmr.msrb.gmra.mxu2 %v171_v30 }
 0x196   :  { %v207_v37 = vpop.f32.mrf.mxu0 }
 0x197   :  { %v210_v38 = vadd.f32 %v207_v37, %v129_v36 }
 0x199   :  { %v211_v39 = vmax.f32 %v210_v38, 0.0 }
 0x19b   :  { %324 = vmatmul.f32.vlgmr.msrb.gmra.mxu3 %v211_v39 }
 0x19c   :  { %v305_v42 = vpop.f32.mrf.mxu2 }
 0x19d   :  { %v306_v44 = vadd.f32 %v305_v42, %v286_v43 }
 0x21e   :  { %v325_v45 = vpop.f32.mrf.mxu3 }
 0x21f   :  { %v326_v46 = vadd.f32 %v325_v45, %v306_v44 }
 0x221   :  { %329 = vst.msk [vmem:[#allocation8] sm:$0xff] %vm328_vm1, %v326_v46 }
 0x222   :  { %340 = dma.vmem_to_hbm [thread:$0]  %s336_s18, 128, %s338_s20, [#allocation5]  }
 0x223   :  { %463 = dma.done.wait [#allocation5], 128  }
 0x224   :  { %464 = vsyncadd [#allocation5], 4294967168 }
 0x225   :  { %345 = vsyncpa [#allocation4], 1 }
 0x226   :  { %346 = vsyncpa [#allocation7], 1 }
 0x227   :  { %347 = vsyncpa [#allocation5], 1 }

</bundles_post_ra>
